<compile_context>
chip_gen: v6e
topology: v6e:2x2x1
jax: 0.10.0
libtpu: 0.0.40
codegen_flags: <defaults>
</compile_context>

<pallas_src>
import functools

import jax
import jax.numpy as jnp
from jax.experimental import pallas as pl
from jax.experimental.pallas import tpu as pltpu

BN_EPS = 1e-5
LEAKY_SLOPE = 0.2


def _leaky_relu(x, slope=LEAKY_SLOPE):
    return jnp.where(x >= 0, x, slope * x)


# --------------------------------------------------------------------------- #
# Kernel: one batch tile per grid step.  x arrives already bf16.
# --------------------------------------------------------------------------- #
def encoder_kernel(x_ref, w1_ref, b1_ref, w2_ref, b2_ref, wh_ref, bh_ref, out_ref):
    # block 1 (BN folded into the linear): Linear -> LeakyReLU
    h = jnp.dot(x_ref[...], w1_ref[...],
                preferred_element_type=jnp.float32) + b1_ref[...]
    h = _leaky_relu(h)

    # block 2: Linear -> LeakyReLU      (Dropout is identity in eval mode)
    h = jnp.dot(h.astype(w2_ref.dtype), w2_ref[...],
                preferred_element_type=jnp.float32) + b2_ref[...]
    h = _leaky_relu(h)

    # fused heads: [mean | logvar] -> one matmul, one store (2*latent columns)
    out_ref[...] = (
        jnp.dot(h.astype(wh_ref.dtype), wh_ref[...],
                preferred_element_type=jnp.float32) + bh_ref[...]
    ).astype(out_ref.dtype)


# --------------------------------------------------------------------------- #
# Param prep: fold BN into the linears, fuse heads, cast matmul operands bf16.
# --------------------------------------------------------------------------- #
def prep_params(raw, matmul_dtype=jnp.bfloat16):
    def fold(w, b, g, be, rm, rv):
        scale = g * jax.lax.rsqrt(rv + BN_EPS)            # [1, F]
        return w * scale, (b - rm) * scale + be           # [in, F], [1, F]

    w1, b1 = fold(raw["w1"], raw["b1"], raw["g1"], raw["be1"], raw["rm1"], raw["rv1"])
    w2, b2 = fold(raw["w2"], raw["b2"], raw["g2"], raw["be2"], raw["rm2"], raw["rv2"])

    wh = jnp.concatenate([raw["wm"], raw["wl"]], axis=1)   # [h1, 2*latent]
    bh = jnp.concatenate([raw["bm"], raw["bl"]], axis=1)   # [1, 2*latent]

    return dict(
        w1=w1.astype(matmul_dtype), b1=b1.astype(jnp.float32),
        w2=w2.astype(matmul_dtype), b2=b2.astype(jnp.float32),
        wh=wh.astype(matmul_dtype), bh=bh.astype(jnp.float32),
    )


# --------------------------------------------------------------------------- #
# Batch-tile choice (host-side, static):
#   * small/medium B  -> one grid step (per-step overhead dominates this kernel)
#   * large B         -> ~`target`-row tiles, even step count (v7x 2-TC split)
# --------------------------------------------------------------------------- #
def choose_tile_b(B, target=1024):
    pad8 = -(-B // 8) * 8
    if pad8 <= target:
        return pad8                          # grid=(1,)
    n = -(-pad8 // target)
    if n > 1 and n % 2:                      # even tile count for v7x's 2 TCs
        n += 1
    tile = -(-pad8 // n)
    return -(-tile // 8) * 8                 # round up to sublane multiple


# --------------------------------------------------------------------------- #
# Wrapper: batch grid, weight-resident BlockSpecs, head split.
# --------------------------------------------------------------------------- #
@functools.partial(jax.jit, static_argnames=("latent_dim", "tile_b"))
def encoder_forward(x, p, *, latent_dim, tile_b):
    B, d_in = x.shape
    h0 = p["w1"].shape[1]
    h1 = p["w2"].shape[1]
    head = p["wh"].shape[1]                  # 2 * latent_dim (no lane padding)

    n_tiles = pl.cdiv(B, tile_b)
    b_pad = n_tiles * tile_b
    x = x.astype(p["w1"].dtype)              # bf16 input stream: half the DMA bytes
    if b_pad != B:
        x = jnp.pad(x, ((0, b_pad - B), (0, 0)))

    # Weights / biases: full-array blocks with constant index_map -> stay
    # VMEM-resident across all grid steps.
    def resident(a):
        return pl.BlockSpec(a.shape, lambda i: (0, 0))

    flops = 2 * b_pad * (d_in * h0 + h0 * h1 + h1 * head)
    bytes_accessed = (
        2 * b_pad * d_in                                    # bf16 x in
        + 4 * b_pad * head                                  # f32 out
        + 2 * (d_in * h0 + h0 * h1 + h1 * head)             # bf16 weights
        + 4 * (h0 + h1 + head)                              # f32 biases
    )

    out = pl.pallas_call(
        encoder_kernel,
        out_shape=jax.ShapeDtypeStruct((b_pad, head), jnp.float32),
        grid=(n_tiles,),
        in_specs=[
            pl.BlockSpec((tile_b, d_in), lambda i: (i, 0)),
            resident(p["w1"]), resident(p["b1"]),
            resident(p["w2"]), resident(p["b2"]),
            resident(p["wh"]), resident(p["bh"]),
        ],
        out_specs=pl.BlockSpec((tile_b, head), lambda i: (i, 0)),
        compiler_params=pltpu.CompilerParams(
            dimension_semantics=("parallel",)),
        cost_estimate=pl.CostEstimate(
            flops=flops, transcendentals=0, bytes_accessed=bytes_accessed),
    )(x, p["w1"], p["b1"], p["w2"], p["b2"], p["wh"], p["bh"])

    mean = out[:B, :latent_dim]
    logvar = out[:B, latent_dim:2 * latent_dim]
    return mean, logvar


# --------------------------------------------------------------------------- #
# Init + references.
# --------------------------------------------------------------------------- #
def init_params(key, input_dim, hidden_dims, latent_dim):
    """PyTorch-default-like Linear init; randomized BN stats (eval mode)."""
    def linear(k, fan_in, fan_out):
        kw, kb = jax.random.split(k)
        bound = 1.0 / jnp.sqrt(fan_in)
        w = jax.random.uniform(kw, (fan_in, fan_out), jnp.float32, -bound, bound)
        b = jax.random.uniform(kb, (1, fan_out), jnp.float32, -bound, bound)
        return w, b

    k1, k2, k3, k4, k5, k6 = jax.random.split(key, 6)
    h0, h1 = hidden_dims
    w1, b1 = linear(k1, input_dim, h0)
    w2, b2 = linear(k2, h0, h1)
    wm, bm = linear(k3, h1, latent_dim)
    wl, bl = linear(k4, h1, latent_dim)

    def bn(k, f):
        ka, kb_, kc, kd = jax.random.split(k, 4)
        g = jax.random.uniform(ka, (1, f), jnp.float32, 0.8, 1.2)
        be = 0.1 * jax.random.normal(kb_, (1, f), jnp.float32)
        rm = 0.1 * jax.random.normal(kc, (1, f), jnp.float32)
        rv = jax.random.uniform(kd, (1, f), jnp.float32, 0.8, 1.2)
        return g, be, rm, rv

    g1, be1, rm1, rv1 = bn(k5, h0)
    g2, be2, rm2, rv2 = bn(k6, h1)

    return dict(
        w1=w1, b1=b1, g1=g1, be1=be1, rm1=rm1, rv1=rv1,
        w2=w2, b2=b2, g2=g2, be2=be2, rm2=rm2, rv2=rv2,
        wm=wm, bm=bm, wl=wl, bl=bl,
    )


def encoder_reference_f32(x, raw):
    """Original module semantics (unfused, f32, eval mode)."""
    h = x @ raw["w1"] + raw["b1"]
    h = (h - raw["rm1"]) * jax.lax.rsqrt(raw["rv1"] + BN_EPS) * raw["g1"] + raw["be1"]
    h = _leaky_relu(h)
    h = h @ raw["w2"] + raw["b2"]
    h = (h - raw["rm2"]) * jax.lax.rsqrt(raw["rv2"] + BN_EPS) * raw["g2"] + raw["be2"]
    h = _leaky_relu(h)
    return h @ raw["wm"] + raw["bm"], h @ raw["wl"] + raw["bl"]


def encoder_reference_prepped(x, p, latent_dim):
    """Exact math of the kernel (folded BN, bf16 matmul operands, f32 accum)."""
    def mm(a, w):
        return jnp.dot(a.astype(w.dtype), w, preferred_element_type=jnp.float32)
    h = _leaky_relu(mm(x, p["w1"]) + p["b1"])
    h = _leaky_relu(mm(h, p["w2"]) + p["b2"])
    out = mm(h, p["wh"]) + p["bh"]
    return out[:, :latent_dim], out[:, latent_dim:2 * latent_dim]


if __name__ == "__main__":
    B = 256
    input_dim = 32
    hidden_dims = (64, 32)
    latent_dim = 16
    dropout_rate = 0.1  # unused in eval mode (identity)

    key = jax.random.PRNGKey(0)
    kx, kp = jax.random.split(key)
    x = jax.random.normal(kx, (B, input_dim), jnp.float32)
    raw = init_params(kp, input_dim, hidden_dims, latent_dim)
    prepped = prep_params(raw)

    tile_b = choose_tile_b(B)                 # -> 256: single grid step
    mean, logvar = encoder_forward(x, prepped, latent_dim=latent_dim, tile_b=tile_b)
    jax.block_until_ready((mean, logvar))
    assert mean.shape == (B, latent_dim) and logvar.shape == (B, latent_dim)

    # Tight check: kernel vs. a pure-JAX reference doing the same folded/bf16 math.
    m_ref, l_ref = encoder_reference_prepped(x, prepped, latent_dim)
    assert jnp.allclose(mean, m_ref, atol=1e-4, rtol=1e-4)
    assert jnp.allclose(logvar, l_ref, atol=1e-4, rtol=1e-4)

    # Sanity check: original (unfused, f32) module semantics within bf16 tolerance.
    m_f32, l_f32 = encoder_reference_f32(x, raw)
    assert jnp.allclose(mean, m_f32, atol=5e-2, rtol=5e-2)
    assert jnp.allclose(logvar, l_f32, atol=5e-2, rtol=5e-2)

    # Exercise the multi-tile path too (even tile count, batch padding).
    B2 = 2500
    x2 = jax.random.normal(jax.random.PRNGKey(1), (B2, input_dim), jnp.float32)
    tile_b2 = choose_tile_b(B2)
    m2, l2 = encoder_forward(x2, prepped, latent_dim=latent_dim, tile_b=tile_b2)
    jax.block_until_ready((m2, l2))
    m2_ref, l2_ref = encoder_reference_prepped(x2, prepped, latent_dim)
    assert jnp.allclose(m2, m2_ref, atol=1e-4, rtol=1e-4)
    assert jnp.allclose(l2, l2_ref, atol=1e-4, rtol=1e-4)

    print("KERNEL_OK")
</pallas_src>

<mosaic_0001>
module attributes {stable_mosaic.version = 11 : i64} {
  func.func @encoder_kernel(%arg0: i32, %arg1: memref<256x32xbf16, #tpu.memory_space<vmem>>, %arg2: memref<32x64xbf16, #tpu.memory_space<vmem>>, %arg3: memref<1x64xf32, #tpu.memory_space<vmem>>, %arg4: memref<64x32xbf16, #tpu.memory_space<vmem>>, %arg5: memref<1x32xf32, #tpu.memory_space<vmem>>, %arg6: memref<32x32xbf16, #tpu.memory_space<vmem>>, %arg7: memref<1x32xf32, #tpu.memory_space<vmem>>, %arg8: memref<256x32xf32, #tpu.memory_space<vmem>>) attributes {dimension_semantics = [#tpu.dimension_semantics<parallel>], iteration_bounds = array<i64: 1>, scalar_prefetch = 0 : i64, scratch_operands = 0 : i64, tpu.core_type = #tpu.core_type<tc>, window_params = [{transform_indices = @transform_0, window_bounds = array<i64: 256, 32>}, {pipeline_mode = #tpu.pipeline_mode<synchronous>, transform_indices = @transform_1, window_bounds = array<i64: 32, 64>}, {pipeline_mode = #tpu.pipeline_mode<synchronous>, transform_indices = @transform_2, window_bounds = array<i64: 1, 64>}, {pipeline_mode = #tpu.pipeline_mode<synchronous>, transform_indices = @transform_3, window_bounds = array<i64: 64, 32>}, {pipeline_mode = #tpu.pipeline_mode<synchronous>, transform_indices = @transform_4, window_bounds = array<i64: 1, 32>}, {pipeline_mode = #tpu.pipeline_mode<synchronous>, transform_indices = @transform_5, window_bounds = array<i64: 32, 32>}, {pipeline_mode = #tpu.pipeline_mode<synchronous>, transform_indices = @transform_6, window_bounds = array<i64: 1, 32>}, {transform_indices = @transform_7, window_bounds = array<i64: 256, 32>}]} {
    %c0 = arith.constant 0 : index
    %c0_0 = arith.constant 0 : index
    %0 = vector.load %arg1[%c0, %c0_0] : memref<256x32xbf16, #tpu.memory_space<vmem>>, vector<256x32xbf16>
    %c0_1 = arith.constant 0 : index
    %c0_2 = arith.constant 0 : index
    %1 = vector.load %arg2[%c0_1, %c0_2] : memref<32x64xbf16, #tpu.memory_space<vmem>>, vector<32x64xbf16>
    %cst = arith.constant dense<0.000000e+00> : vector<256x64xf32>
    %2 = tpu.matmul %0, %1, %cst {dimension_numbers = #tpu.dot_dimension_numbers<[1], [0], [0], [1], [0, 0, 1, 1], [], []>} : vector<256x32xbf16>, vector<32x64xbf16>, vector<256x64xf32> -> vector<256x64xf32>
    %c0_3 = arith.constant 0 : index
    %c0_4 = arith.constant 0 : index
    %3 = vector.load %arg3[%c0_3, %c0_4] : memref<1x64xf32, #tpu.memory_space<vmem>>, vector<1x64xf32>
    %4 = vector.broadcast %3 : vector<1x64xf32> to vector<256x64xf32>
    %5 = arith.addf %2, %4 : vector<256x64xf32>
    %cst_5 = arith.constant 0.000000e+00 : f32
    %6 = vector.broadcast %cst_5 : f32 to vector<256x64xf32>
    %7 = arith.cmpf oge, %5, %6 : vector<256x64xf32>
    %cst_6 = arith.constant 2.000000e-01 : f32
    %8 = vector.broadcast %cst_6 : f32 to vector<256x64xf32>
    %9 = arith.mulf %8, %5 : vector<256x64xf32>
    %10 = arith.select %7, %5, %9 : vector<256x64xi1>, vector<256x64xf32>
    %11 = arith.truncf %10 : vector<256x64xf32> to vector<256x64xbf16>
    %c0_7 = arith.constant 0 : index
    %c0_8 = arith.constant 0 : index
    %12 = vector.load %arg4[%c0_7, %c0_8] : memref<64x32xbf16, #tpu.memory_space<vmem>>, vector<64x32xbf16>
    %cst_9 = arith.constant dense<0.000000e+00> : vector<256x32xf32>
    %13 = tpu.matmul %11, %12, %cst_9 {dimension_numbers = #tpu.dot_dimension_numbers<[1], [0], [0], [1], [0, 0, 1, 1], [], []>} : vector<256x64xbf16>, vector<64x32xbf16>, vector<256x32xf32> -> vector<256x32xf32>
    %c0_10 = arith.constant 0 : index
    %c0_11 = arith.constant 0 : index
    %14 = vector.load %arg5[%c0_10, %c0_11] : memref<1x32xf32, #tpu.memory_space<vmem>>, vector<1x32xf32>
    %15 = vector.broadcast %14 : vector<1x32xf32> to vector<256x32xf32>
    %16 = arith.addf %13, %15 : vector<256x32xf32>
    %cst_12 = arith.constant 0.000000e+00 : f32
    %17 = vector.broadcast %cst_12 : f32 to vector<256x32xf32>
    %18 = arith.cmpf oge, %16, %17 : vector<256x32xf32>
    %cst_13 = arith.constant 2.000000e-01 : f32
    %19 = vector.broadcast %cst_13 : f32 to vector<256x32xf32>
    %20 = arith.mulf %19, %16 : vector<256x32xf32>
    %21 = arith.select %18, %16, %20 : vector<256x32xi1>, vector<256x32xf32>
    %22 = arith.truncf %21 : vector<256x32xf32> to vector<256x32xbf16>
    %c0_14 = arith.constant 0 : index
    %c0_15 = arith.constant 0 : index
    %23 = vector.load %arg6[%c0_14, %c0_15] : memref<32x32xbf16, #tpu.memory_space<vmem>>, vector<32x32xbf16>
    %cst_16 = arith.constant dense<0.000000e+00> : vector<256x32xf32>
    %24 = tpu.matmul %22, %23, %cst_16 {dimension_numbers = #tpu.dot_dimension_numbers<[1], [0], [0], [1], [0, 0, 1, 1], [], []>} : vector<256x32xbf16>, vector<32x32xbf16>, vector<256x32xf32> -> vector<256x32xf32>
    %c0_17 = arith.constant 0 : index
    %c0_18 = arith.constant 0 : index
    %25 = vector.load %arg7[%c0_17, %c0_18] : memref<1x32xf32, #tpu.memory_space<vmem>>, vector<1x32xf32>
    %26 = vector.broadcast %25 : vector<1x32xf32> to vector<256x32xf32>
    %27 = arith.addf %24, %26 : vector<256x32xf32>
    %c0_19 = arith.constant 0 : index
    %c0_20 = arith.constant 0 : index
    %28 = vector.load %arg8[%c0_19, %c0_20] : memref<256x32xf32, #tpu.memory_space<vmem>>, vector<256x32xf32>
    tpu.vector_store %arg8[%c0_19, %c0_20], %27 {strides = array<i32>} : memref<256x32xf32, #tpu.memory_space<vmem>>, vector<256x32xf32>,
    return
  }
  func.func @transform_0(%arg0: i32) -> (i32, i32) {
    %c0_i32 = arith.constant 0 : i32
    %c0_i32_0 = arith.constant 0 : i32
    return %arg0, %c0_i32 : i32, i32
  }
  func.func @transform_1(%arg0: i32) -> (i32, i32) {
    %c0_i32 = arith.constant 0 : i32
    %c0_i32_0 = arith.constant 0 : i32
    %c0_i32_1 = arith.constant 0 : i32
    return %c0_i32, %c0_i32_0 : i32, i32
  }
  func.func @transform_2(%arg0: i32) -> (i32, i32) {
    %c0_i32 = arith.constant 0 : i32
    %c0_i32_0 = arith.constant 0 : i32
    %c0_i32_1 = arith.constant 0 : i32
    return %c0_i32, %c0_i32_0 : i32, i32
  }
  func.func @transform_3(%arg0: i32) -> (i32, i32) {
    %c0_i32 = arith.constant 0 : i32
    %c0_i32_0 = arith.constant 0 : i32
    %c0_i32_1 = arith.constant 0 : i32
    return %c0_i32, %c0_i32_0 : i32, i32
  }
  func.func @transform_4(%arg0: i32) -> (i32, i32) {
    %c0_i32 = arith.constant 0 : i32
    %c0_i32_0 = arith.constant 0 : i32
    %c0_i32_1 = arith.constant 0 : i32
    return %c0_i32, %c0_i32_0 : i32, i32
  }
  func.func @transform_5(%arg0: i32) -> (i32, i32) {
    %c0_i32 = arith.constant 0 : i32
    %c0_i32_0 = arith.constant 0 : i32
    %c0_i32_1 = arith.constant 0 : i32
    return %c0_i32, %c0_i32_0 : i32, i32
  }
  func.func @transform_6(%arg0: i32) -> (i32, i32) {
    %c0_i32 = arith.constant 0 : i32
    %c0_i32_0 = arith.constant 0 : i32
    %c0_i32_1 = arith.constant 0 : i32
    return %c0_i32, %c0_i32_0 : i32, i32
  }
  func.func @transform_7(%arg0: i32) -> (i32, i32) {
    %c0_i32 = arith.constant 0 : i32
    %c0_i32_0 = arith.constant 0 : i32
    return %arg0, %c0_i32 : i32, i32
  }
}

</mosaic_0001>

<bundles_post_ra>
// kernel: encoder_forward.1
= control target key start
LH: loop header
LB: loop body
LE: loop exit
PB: predicated region body
PF: predicated region fallthrough
CT: control target
= control target key end

     0   :  { %vm162_vm0 = vcmask 261120   ;;  %vm523_vm5 = vcmask 523264   ;;  %s1815_s1 = inlined_call_operand.vmem [shape: bf16[32,64], index: 1, kind: input, shape index: {}]   ;;  %s1816_s0 = inlined_call_operand.vmem [shape: bf16[256,32], index: 0, kind: input, shape index: {}]   ;;  %s1817_s3 = inlined_call_operand.vmem [shape: bf16[64,32], index: 3, kind: input, shape index: {}]   ;;  %s1818_s5 = inlined_call_operand.vmem [shape: bf16[32,32], index: 5, kind: input, shape index: {}]   ;;  %s1819_s2 = inlined_call_operand.vmem [shape: f32[1,64], index: 2, kind: input, shape index: {}]   ;;  %s1820_s4 = inlined_call_operand.vmem [shape: f32[1,32], index: 4, kind: input, shape index: {}]   ;;  %s1821_s6 = inlined_call_operand.vmem [shape: f32[1,32], index: 6, kind: input, shape index: {}]   ;;  %s1822_s7 = inlined_call_operand.vmem [shape: f32[256,32], index: 7, kind: output, shape index: {}]  }
   0x1   :  { %v1360_v0 = vld [vmem:[%s1815_s1 + $0x8] sm:$0xff]   ;;  %v1361_v1 = vld [vmem:[%s1815_s1] sm:$0xff]   ;;  %v1364_v4 = vld [vmem:[%s1816_s0 + $0x10] sm:$0xff]  }
   0x2   :  { %1244 = vmatprep.subr.bf16.mxu0 %v1360_v0  ;;  %v1362_v2 = vld [vmem:[%s1816_s0] sm:$0xff]   ;;  %1356 = vmatprep.subr.bf16.mxu1 %v1360_v0  ;;  %v1363_v3 = vld [vmem:[%s1816_s0 + $0x8] sm:$0xff]   ;;  %v1372_v7 = vld [vmem:[%s1816_s0 + $0x50] sm:$0xff]  }
   0x3   :  { %1245 = vmatpush3.bf16.msra.mxu0 %v1360_v0  ;;  %1358 = vmatpush3.bf16.msra.mxu1 %v1360_v0  ;;  %v1369_v5 = vld [vmem:[%s1816_s0 + $0x40] sm:$0xff]   ;;  %v1371_v6 = vld [vmem:[%s1816_s0 + $0x48] sm:$0xff]   ;;  %v1365_v8 = vld [vmem:[%s1816_s0 + $0x18] sm:$0xff]  }
   0x4   :  { %1246 = vmatprep.subr.bf16.mxu0 %v1361_v1  ;;  %1248 = vmatprep.mubr.msk.bf16.mxu0 %vm162_vm0, %v1362_v2  ;;  %v1366_v9 = vld [vmem:[%s1816_s0 + $0x20] sm:$0xff]   ;;  %v1373_v10 = vld [vmem:[%s1816_s0 + $0x58] sm:$0xff]   ;;  %v1379_v13 = vld [vmem:[%s1817_s3 + $0x10] sm:$0xff]  }
   0x5   :  { %1357 = vmatprep.subr.bf16.mxu1 %v1361_v1  ;;  %1264 = vmatprep.mubr.msk.bf16.mxu1 %vm162_vm0, %v1369_v5  ;;  %v1374_v11 = vld [vmem:[%s1816_s0 + $0x60] sm:$0xff]   ;;  %v1378_v12 = vld [vmem:[%s1817_s3 + $0x18] sm:$0xff]   ;;  %v1367_v14 = vld [vmem:[%s1816_s0 + $0x28] sm:$0xff]  }
   0x6   :  { %v1368_v15 = vld [vmem:[%s1816_s0 + $0x30] sm:$0xff]   ;;  %v1380_v16 = vld [vmem:[%s1817_s3 + $0x8] sm:$0xff]   ;;  %v1370_v19 = vld [vmem:[%s1816_s0 + $0x38] sm:$0xff]  }
   0x7   :  { %1247 = vmatpush3.bf16.msra.mxu0 %v1361_v1  ;;  %1359 = vmatpush3.bf16.msra.mxu1 %v1361_v1  ;;  %v1375_v17 = vld [vmem:[%s1816_s0 + $0x68] sm:$0xff]   ;;  %v1376_v18 = vld [vmem:[%s1816_s0 + $0x70] sm:$0xff]   ;;  %v1377_v20 = vld [vmem:[%s1816_s0 + $0x78] sm:$0xff]  }
   0x8   :  { %1280 = vmatprep.subr.bf16.mxu1 %v1378_v12  ;;  %v1381_v21 = vld [vmem:[%s1817_s3] sm:$0xff]   ;;  %v1382_v22 = vld [vmem:[%s1818_s5 + $0x8] sm:$0xff]  }
   0x9   :  { %v1383_v23 = vld [vmem:[%s1818_s5] sm:$0xff]   ;;  %1320 = vmatprep.subr.bf16.mxu0 %v1382_v22 }
   0xa   :  { %1249 = vmatmul.mubr.msk.bf16.vlgmr.msra.gmra.mxu0 %vm162_vm0, %v1363_v3  ;;  %1265 = vmatmul.mubr.msk.bf16.vlgmr.msra.gmra.mxu1 %vm162_vm0, %v1371_v6  ;;  %v1515_v25 = vld [vmem:[%s1819_s2] ss:$0 sm:$0xff] }
   0xb   :  { %1252 = vmatprep.mubr.msk.bf16.mxu0 %vm162_vm0, %v1364_v4  ;;  %1268 = vmatprep.mubr.msk.bf16.mxu1 %vm162_vm0, %v1372_v7 }
   0xc   :  { %1281 = vmatpush3.bf16.msra.mxu1 %v1378_v12  ;;  %1321 = vmatpush3.bf16.msra.mxu0 %v1382_v22 }
   0xd   :  { %1282 = vmatprep.subr.bf16.mxu1 %v1379_v13  ;;  %1322 = vmatprep.subr.bf16.mxu0 %v1383_v23 }
  0x10   :  { %1283 = vmatpush3.bf16.msra.mxu1 %v1379_v13  ;;  %1323 = vmatpush3.bf16.msra.mxu0 %v1383_v23 }
  0x11   :  { %1284 = vmatprep.subr.bf16.mxu1 %v1380_v16 }
  0x12   :  { %1253 = vmatmul.mubr.msk.bf16.gmra.mxu0 %vm162_vm0, %v1365_v8  ;;  %1269 = vmatmul.mubr.msk.bf16.gmra.mxu1 %vm162_vm0, %v1373_v10 }
  0x13   :  { %1256 = vmatprep.mubr.msk.bf16.mxu0 %vm162_vm0, %v1366_v9  ;;  %1272 = vmatprep.mubr.msk.bf16.mxu1 %vm162_vm0, %v1374_v11 }
  0x14   :  { %1285 = vmatpush3.bf16.msra.mxu1 %v1380_v16 }
  0x15   :  { %1286 = vmatprep.subr.bf16.mxu1 %v1381_v21 }
  0x18   :  { %1287 = vmatpush3.bf16.msra.mxu1 %v1381_v21 }
  0x1a   :  { %1257 = vmatmul.mubr.msk.bf16.gmra.mxu0 %vm162_vm0, %v1367_v14  ;;  %1273 = vmatmul.mubr.msk.bf16.gmra.mxu1 %vm162_vm0, %v1375_v17 }
  0x1b   :  { %1260 = vmatprep.mubr.msk.bf16.mxu0 %vm162_vm0, %v1368_v15  ;;  %1276 = vmatprep.mubr.msk.bf16.mxu1 %vm162_vm0, %v1376_v18 }
  0x22   :  { %1261 = vmatmul.mubr.msk.bf16.gmra.mxu0 %vm162_vm0, %v1370_v19  ;;  %1277 = vmatmul.mubr.msk.bf16.gmra.mxu1 %vm162_vm0, %v1377_v20 }
  0xca   :  { %v1250_v24 = vpop.f32.mrf.mxu0  ;;  %v1518_v28 = vpop.f32.mrf.mxu1 }
  0xcb   :  { %v254_v29 = vadd.f32 %v1250_v24, %v1515_v25 }
  0xcc   :  { %v245_v26 = vpop.f32.mrf.mxu0  ;;  %v1522_v32 = vpop.f32.mrf.mxu1 }
  0xcd   :  { %v246_v27 = vadd.f32 %v1515_v25, %v245_v26  ;;  %v406_v38 = vmul.f32 0.2, %v254_v29  ;;  %vm374_vm3 = vcmp.ge.f32.partialorder %v254_v29, 0.0  ;;  %v310_v22 = vadd.f32 %v1515_v25, %v1522_v32 }
  0xce   :  { %v1251_v30 = vpop.f32.mrf.mxu0  ;;  %v1525_v37 = vpop.f32.mrf.mxu1 }
  0xcf   :  { %v257_v31 = vadd.f32 %v1251_v30, %v1515_v25  ;;  %v404_v34 = vmul.f32 0.2, %v246_v27  ;;  %vm372_vm2 = vcmp.ge.f32.partialorder %v246_v27, 0.0  ;;  %v438_v48 = vsel %vm374_vm3, %v254_v29, %v406_v38 }
  0xd0   :  { %v248_v33 = vpop.f32.mrf.mxu0  ;;  %v312_v41 = vpop.f32.mrf.mxu1  ;;  %vm388_vm14 = vcmp.ge.f32.partialorder %v310_v22, 0.0  ;;  %v420_v38 = vmul.f32 0.2, %v310_v22 }
  0xd1   :  { %vm375_vm1 = vcmp.ge.f32.partialorder %v257_v31, 0.0  ;;  %v407_v35 = vmul.f32 0.2, %v257_v31  ;;  %v249_v36 = vadd.f32 %v1515_v25, %v248_v33  ;;  %v436_v44 = vsel %vm372_vm2, %v246_v27, %v404_v34 }
  0xd2   :  { %v1254_v39 = vpop.f32.mrf.mxu0  ;;  %v1528_v47 = vpop.f32.mrf.mxu1  ;;  %v313_v23 = vadd.f32 %v1515_v25, %v312_v41 }
  0xd3   :  { %vm373_vm4 = vcmp.ge.f32.partialorder %v249_v36, 0.0  ;;  %v405_v40 = vmul.f32 0.2, %v249_v36  ;;  %v439_v42 = vsel %vm375_vm1, %v257_v31, %v407_v35  ;;  %v270_v50 = vadd.f32 %v1254_v39, %v1515_v25 }
  0xd4   :  { %v261_v43 = vpop.f32.mrf.mxu0  ;;  %v469_v52 = vpack.c.bf16 %v439_v42, %v438_v48  ;;  %v1532_v54 = vpop.f32.mrf.mxu1  ;;  %vm389_vm15 = vcmp.ge.f32.partialorder %v313_v23, 0.0  ;;  %v421_v32 = vmul.f32 0.2, %v313_v23  ;;  %v452_v48 = vsel %vm388_vm14, %v310_v22, %v420_v38 }
  0xd5   :  { %v437_v45 = vsel %vm373_vm4, %v249_v36, %v405_v40  ;;  %v262_v46 = vadd.f32 %v1515_v25, %v261_v43  ;;  %v410_v60 = vmul.f32 0.2, %v270_v50  ;;  %vm378_vm8 = vcmp.ge.f32.partialorder %v270_v50, 0.0 }
  0xd6   :  { %v468_v49 = vpack.c.bf16 %v437_v45, %v436_v44  ;;  %v1255_v51 = vpop.f32.mrf.mxu0  ;;  %v1537_v59 = vpop.f32.mrf.mxu1  ;;  %v318_v45 = vadd.f32 %v1518_v28, %v1515_v25 }
  0xd7   :  { %v273_v53 = vadd.f32 %v1255_v51, %v1515_v25  ;;  %v408_v56 = vmul.f32 0.2, %v262_v46  ;;  %vm376_vm7 = vcmp.ge.f32.partialorder %v262_v46, 0.0  ;;  %v442_v5 = vsel %vm378_vm8, %v270_v50, %v410_v60 }
  0xd8   :  { %v264_v55 = vpop.f32.mrf.mxu0  ;;  %1288 = vmatprep.mubr.msk.bf16.mxu1 %vm523_vm5, %v468_v49  ;;  %v1539_v63 = vpop.f32.mrf.mxu1  ;;  %v321_v50 = vadd.f32 %v1525_v37, %v1515_v25  ;;  %v453_v51 = vsel %vm389_vm15, %v313_v23, %v421_v32 }
  0xd9   :  { %vm379_vm6 = vcmp.ge.f32.partialorder %v273_v53, 0.0  ;;  %v411_v57 = vmul.f32 0.2, %v273_v53  ;;  %v265_v58 = vadd.f32 %v1515_v25, %v264_v55  ;;  %1289 = vmatmul.mubr.msk.bf16.vlgmr.msra.gmra.mxu1 %vm523_vm5, %v469_v52  ;;  %v440_v2 = vsel %vm376_vm7, %v262_v46, %v408_v56 }
  0xda   :  { %v1258_v61 = vpop.f32.mrf.mxu0  ;;  %v1543_v9 = vpop.f32.mrf.mxu1  ;;  %v326_v55 = vadd.f32 %v1515_v25, %v1532_v54  ;;  %v329_v56 = vadd.f32 %v1515_v25, %v1539_v63  ;;  %vm391_vm7 = vcmp.ge.f32.partialorder %v321_v50, 0.0 }
  0xdb   :  { %vm377_vm9 = vcmp.ge.f32.partialorder %v265_v58, 0.0  ;;  %v409_v62 = vmul.f32 0.2, %v265_v58  ;;  %v443_v0 = vsel %vm379_vm6, %v273_v53, %v411_v57  ;;  %v286_v7 = vadd.f32 %v1258_v61, %v1515_v25 }
  0xdc   :  { %v277_v1 = vpop.f32.mrf.mxu0  ;;  %v471_v10 = vpack.c.bf16 %v443_v0, %v442_v5  ;;  %v1549_v18 = vpop.f32.mrf.mxu1  ;;  %v422_v61 = vmul.f32 0.2, %v318_v45  ;;  %v476_v0 = vpack.c.bf16 %v453_v51, %v452_v48  ;;  %vm390_vm6 = vcmp.ge.f32.partialorder %v318_v45, 0.0 }
  0xdd   :  { %v441_v3 = vsel %vm377_vm9, %v265_v58, %v409_v62  ;;  %v278_v4 = vadd.f32 %v1515_v25, %v277_v1  ;;  %v414_v16 = vmul.f32 0.2, %v286_v7  ;;  %vm382_vm12 = vcmp.ge.f32.partialorder %v286_v7, 0.0 }
  0xde   :  { %v470_v6 = vpack.c.bf16 %v441_v3, %v440_v2  ;;  %v1259_v8 = vpop.f32.mrf.mxu0  ;;  %v1556_v34 = vpop.f32.mrf.mxu1  ;;  %v423_v62 = vmul.f32 0.2, %v321_v50  ;;  %v424_v37 = vmul.f32 0.2, %v326_v55  ;;  %v425_v1 = vmul.f32 0.2, %v329_v56 }
  0xdf   :  { %v289_v11 = vadd.f32 %v1259_v8, %v1515_v25  ;;  %v412_v13 = vmul.f32 0.2, %v278_v4  ;;  %vm380_vm11 = vcmp.ge.f32.partialorder %v278_v4, 0.0  ;;  %v446_v29 = vsel %vm382_vm12, %v286_v7, %v414_v16 }
  0xe0   :  { %v280_v12 = vpop.f32.mrf.mxu0  ;;  %1292 = vmatprep.mubr.msk.bf16.mxu1 %vm523_vm5, %v470_v6  ;;  %v344_v44 = vpop.f32.mrf.mxu1  ;;  %vm392_vm8 = vcmp.ge.f32.partialorder %v326_v55, 0.0  ;;  %vm393_vm9 = vcmp.ge.f32.partialorder %v329_v56, 0.0  ;;  %v454_v63 = vsel %vm390_vm6, %v318_v45, %v422_v61  ;;  %v455_v2 = vsel %vm391_vm7, %v321_v50, %v423_v62 }
  0xe1   :  { %vm383_vm10 = vcmp.ge.f32.partialorder %v289_v11, 0.0  ;;  %v415_v14 = vmul.f32 0.2, %v289_v11  ;;  %v281_v15 = vadd.f32 %v1515_v25, %v280_v12  ;;  %1293 = vmatmul.mubr.msk.bf16.gmra.mxu1 %vm523_vm5, %v471_v10  ;;  %v444_v24 = vsel %vm380_vm11, %v278_v4, %v412_v13 }
  0xe2   :  { %v1262_v17 = vpop.f32.mrf.mxu0  ;;  %v1278_v58 = vpop.f32.mrf.mxu1  ;;  %v334_v3 = vadd.f32 %v1528_v47, %v1515_v25  ;;  %v337_v4 = vadd.f32 %v1537_v59, %v1515_v25  ;;  %v456_v5 = vsel %vm392_vm8, %v326_v55, %v424_v37  ;;  %v457_v6 = vsel %vm393_vm9, %v329_v56, %v425_v1 }
  0xe3   :  { %vm381_vm13 = vcmp.ge.f32.partialorder %v281_v15, 0.0  ;;  %v413_v19 = vmul.f32 0.2, %v281_v15  ;;  %v447_v20 = vsel %vm383_vm10, %v289_v11, %v415_v14  ;;  %v302_v31 = vadd.f32 %v1262_v17, %v1515_v25 }
  0xe4   :  { %v293_v21 = vpop.f32.mrf.mxu0  ;;  %v473_v35 = vpack.c.bf16 %v447_v20, %v446_v29  ;;  %v357_v54 = vpop.f32.mrf.mxu1  ;;  %v342_v7 = vadd.f32 %v1515_v25, %v1549_v18  ;;  %v345_v8 = vadd.f32 %v1515_v25, %v344_v44  ;;  %v477_v11 = vpack.c.bf16 %v455_v2, %v454_v63 }
  0xe5   :  { %v445_v26 = vsel %vm381_vm13, %v281_v15, %v413_v19  ;;  %v294_v27 = vadd.f32 %v1515_v25, %v293_v21  ;;  %v418_v43 = vmul.f32 0.2, %v302_v31  ;;  %vm386_vm3 = vcmp.ge.f32.partialorder %v302_v31, 0.0 }
  0xe6   :  { %v472_v30 = vpack.c.bf16 %v445_v26, %v444_v24  ;;  %v1263_v33 = vpop.f32.mrf.mxu0  ;;  %v1279_v10 = vpop.f32.mrf.mxu1  ;;  %v426_v12 = vmul.f32 0.2, %v334_v3  ;;  %v427_v13 = vmul.f32 0.2, %v337_v4  ;;  %v478_v14 = vpack.c.bf16 %v457_v6, %v456_v5 }
  0xe7   :  { %v305_v36 = vadd.f32 %v1263_v33, %v1515_v25  ;;  %v416_v40 = vmul.f32 0.2, %v294_v27  ;;  %vm384_vm2 = vcmp.ge.f32.partialorder %v294_v27, 0.0  ;;  %v450_v57 = vsel %vm386_vm3, %v302_v31, %v418_v43 }
  0xe8   :  { %v296_v39 = vpop.f32.mrf.mxu0  ;;  %1296 = vmatprep.mubr.msk.bf16.mxu1 %vm523_vm5, %v472_v30  ;;  %vm394_vm10 = vcmp.ge.f32.partialorder %v334_v3, 0.0  ;;  %vm395_vm11 = vcmp.ge.f32.partialorder %v337_v4, 0.0  ;;  %v428_v15 = vmul.f32 0.2, %v342_v7  ;;  %v429_v16 = vmul.f32 0.2, %v345_v8  ;;  %v360_v47 = vpop.f32.mrf.mxu1 }
  0xe9   :  { %vm387_vm1 = vcmp.ge.f32.partialorder %v305_v36, 0.0  ;;  %v419_v41 = vmul.f32 0.2, %v305_v36  ;;  %v297_v42 = vadd.f32 %v1515_v25, %v296_v39  ;;  %1297 = vmatmul.mubr.msk.bf16.gmra.mxu1 %vm523_vm5, %v473_v35  ;;  %v448_v52 = vsel %vm384_vm2, %v294_v27, %v416_v40 }
  0xea   :  { %vm396_vm12 = vcmp.ge.f32.partialorder %v342_v7, 0.0  ;;  %vm397_vm13 = vcmp.ge.f32.partialorder %v345_v8, 0.0  ;;  %v458_v59 = vsel %vm394_vm10, %v334_v3, %v426_v12  ;;  %v459_v17 = vsel %vm395_vm11, %v337_v4, %v427_v13 }
  0xeb   :  { %vm385_vm4 = vcmp.ge.f32.partialorder %v297_v42, 0.0  ;;  %v417_v46 = vmul.f32 0.2, %v297_v42  ;;  %v451_v49 = vsel %vm387_vm1, %v305_v36, %v419_v41  ;;  %v350_v18 = vadd.f32 %v1543_v9, %v1515_v25 }
  0xec   :  { %v475_v60 = vpack.c.bf16 %v451_v49, %v450_v57  ;;  %v353_v19 = vadd.f32 %v1556_v34, %v1515_v25  ;;  %v460_v20 = vsel %vm396_vm12, %v342_v7, %v428_v15  ;;  %v461_v21 = vsel %vm397_vm13, %v345_v8, %v429_v16 }
  0xed   :  { %v449_v53 = vsel %vm385_vm4, %v297_v42, %v417_v46  ;;  %v358_v22 = vadd.f32 %v1515_v25, %v357_v54  ;;  %v361_v23 = vadd.f32 %v1515_v25, %v360_v47  ;;  %v479_v24 = vpack.c.bf16 %v459_v17, %v458_v59 }
  0xee   :  { %v474_v28 = vpack.c.bf16 %v449_v53, %v448_v52  ;;  %v430_v26 = vmul.f32 0.2, %v350_v18  ;;  %v431_v27 = vmul.f32 0.2, %v353_v19  ;;  %v480_v29 = vpack.c.bf16 %v461_v21, %v460_v20 }
  0xef   :  { %vm398_vm14 = vcmp.ge.f32.partialorder %v350_v18, 0.0  ;;  %vm399_vm15 = vcmp.ge.f32.partialorder %v353_v19, 0.0  ;;  %v432_v30 = vmul.f32 0.2, %v358_v22  ;;  %v433_v31 = vmul.f32 0.2, %v361_v23 }
  0xf0   :  { %1300 = vmatprep.mubr.msk.bf16.mxu1 %vm523_vm5, %v474_v28  ;;  %vm400_vm1 = vcmp.ge.f32.partialorder %v358_v22, 0.0  ;;  %vm401_vm2 = vcmp.ge.f32.partialorder %v361_v23, 0.0  ;;  %v462_v9 = vsel %vm398_vm14, %v350_v18, %v430_v26  ;;  %v463_v33 = vsel %vm399_vm15, %v353_v19, %v431_v27 }
  0xf1   :  { %1301 = vmatmul.mubr.msk.bf16.gmra.mxu1 %vm523_vm5, %v475_v60  ;;  %v366_v34 = vadd.f32 %v1278_v58, %v1515_v25  ;;  %v369_v35 = vadd.f32 %v1279_v10, %v1515_v25  ;;  %v464_v36 = vsel %vm400_vm1, %v358_v22, %v432_v30  ;;  %v465_v38 = vsel %vm401_vm2, %v361_v23, %v433_v31  ;;  %v1600_v25 = vld [vmem:[%s1820_s4] ss:$0 sm:$0xff] }
  0xf2   :  { %1304 = vmatprep.mubr.msk.bf16.mxu1 %vm523_vm5, %v476_v0  ;;  %v481_v39 = vpack.c.bf16 %v463_v33, %v462_v9  ;;  %v482_v41 = vpack.c.bf16 %v465_v38, %v464_v36 }
  0xf3   :  { %v434_v32 = vmul.f32 0.2, %v366_v34  ;;  %v435_v40 = vmul.f32 0.2, %v369_v35  ;;  %vm402_vm3 = vcmp.ge.f32.partialorder %v366_v34, 0.0  ;;  %vm403_vm4 = vcmp.ge.f32.partialorder %v369_v35, 0.0 }
  0xf5   :  { %v466_v42 = vsel %vm402_vm3, %v366_v34, %v434_v32  ;;  %v467_v43 = vsel %vm403_vm4, %v369_v35, %v435_v40 }
  0xf6   :  { %v483_v44 = vpack.c.bf16 %v467_v43, %v466_v42 }
  0xf9   :  { %1305 = vmatmul.mubr.msk.bf16.gmra.mxu1 %vm523_vm5, %v477_v11 }
  0xfa   :  { %1308 = vmatprep.mubr.msk.bf16.mxu1 %vm523_vm5, %v478_v14 }
 0x101   :  { %1309 = vmatmul.mubr.msk.bf16.gmra.mxu1 %vm523_vm5, %v479_v24 }
 0x102   :  { %1312 = vmatprep.mubr.msk.bf16.mxu1 %vm523_vm5, %v480_v29 }
 0x109   :  { %1313 = vmatmul.mubr.msk.bf16.gmra.mxu1 %vm523_vm5, %v481_v39 }
 0x10a   :  { %1316 = vmatprep.mubr.msk.bf16.mxu1 %vm523_vm5, %v482_v41 }
 0x111   :  { %1317 = vmatmul.mubr.msk.bf16.gmra.mxu1 %vm523_vm5, %v483_v44 }
 0x199   :  { %v1290_v45 = vpop.f32.mrf.mxu1 }
 0x19a   :  { %v615_v49 = vadd.f32 %v1290_v45, %v1600_v25 }
 0x19b   :  { %v606_v46 = vpop.f32.mrf.mxu1 }
 0x19c   :  { %v607_v48 = vadd.f32 %v1600_v25, %v606_v46  ;;  %v767_v57 = vmul.f32 0.2, %v615_v49  ;;  %vm735_vm7 = vcmp.ge.f32.partialorder %v615_v49, 0.0 }
 0x19d   :  { %v1291_v50 = vpop.f32.mrf.mxu1 }
 0x19e   :  { %v618_v51 = vadd.f32 %v1291_v50, %v1600_v25  ;;  %v765_v53 = vmul.f32 0.2, %v607_v48  ;;  %vm733_vm5 = vcmp.ge.f32.partialorder %v607_v48, 0.0  ;;  %v799_v1 = vsel %vm735_vm7, %v615_v49, %v767_v57 }
 0x19f   :  { %v609_v52 = vpop.f32.mrf.mxu1 }
 0x1a0   :  { %vm736_vm6 = vcmp.ge.f32.partialorder %v618_v51, 0.0  ;;  %v768_v55 = vmul.f32 0.2, %v618_v51  ;;  %v610_v56 = vadd.f32 %v1600_v25, %v609_v52  ;;  %v797_v62 = vsel %vm733_vm5, %v607_v48, %v765_v53 }
 0x1a1   :  { %v1294_v28 = vpop.f32.mrf.mxu1 }
 0x1a2   :  { %vm734_vm8 = vcmp.ge.f32.partialorder %v610_v56, 0.0  ;;  %v766_v58 = vmul.f32 0.2, %v610_v56  ;;  %v800_v60 = vsel %vm736_vm6, %v618_v51, %v768_v55  ;;  %v631_v63 = vadd.f32 %v1294_v28, %v1600_v25 }
 0x1a3   :  { %v622_v61 = vpop.f32.mrf.mxu1  ;;  %v830_v3 = vpack.c.bf16 %v800_v60, %v799_v1 }
 0x1a4   :  { %v798_v0 = vsel %vm734_vm8, %v610_v56, %v766_v58  ;;  %v623_v37 = vadd.f32 %v1600_v25, %v622_v61  ;;  %v771_v10 = vmul.f32 0.2, %v631_v63  ;;  %vm739_vm11 = vcmp.ge.f32.partialorder %v631_v63, 0.0 }
 0x1a5   :  { %v829_v54 = vpack.c.bf16 %v798_v0, %v797_v62  ;;  %v1295_v2 = vpop.f32.mrf.mxu1 }
 0x1a6   :  { %v634_v4 = vadd.f32 %v1295_v2, %v1600_v25  ;;  %v769_v6 = vmul.f32 0.2, %v623_v37  ;;  %vm737_vm10 = vcmp.ge.f32.partialorder %v623_v37, 0.0  ;;  %v803_v59 = vsel %vm739_vm11, %v631_v63, %v771_v10 }
 0x1a7   :  { %v625_v5 = vpop.f32.mrf.mxu1  ;;  %1324 = vmatprep.mubr.msk.bf16.mxu0 %vm162_vm0, %v829_v54 }
 0x1a8   :  { %vm740_vm9 = vcmp.ge.f32.partialorder %v634_v4, 0.0  ;;  %v772_v7 = vmul.f32 0.2, %v634_v4  ;;  %v626_v8 = vadd.f32 %v1600_v25, %v625_v5  ;;  %1325 = vmatmul.mubr.msk.bf16.vlgmr.msra.gmra.mxu0 %vm162_vm0, %v830_v3  ;;  %v801_v15 = vsel %vm737_vm10, %v623_v37, %v769_v6 }
 0x1a9   :  { %v1298_v11 = vpop.f32.mrf.mxu1 }
 0x1aa   :  { %vm738_vm12 = vcmp.ge.f32.partialorder %v626_v8, 0.0  ;;  %v770_v12 = vmul.f32 0.2, %v626_v8  ;;  %v804_v13 = vsel %vm740_vm9, %v634_v4, %v772_v7  ;;  %v647_v18 = vadd.f32 %v1298_v11, %v1600_v25 }
 0x1ab   :  { %v638_v14 = vpop.f32.mrf.mxu1  ;;  %v832_v20 = vpack.c.bf16 %v804_v13, %v803_v59 }
 0x1ac   :  { %v802_v16 = vsel %vm738_vm12, %v626_v8, %v770_v12  ;;  %v639_v47 = vadd.f32 %v1600_v25, %v638_v14  ;;  %v775_v27 = vmul.f32 0.2, %v647_v18  ;;  %vm743_vm15 = vcmp.ge.f32.partialorder %v647_v18, 0.0 }
 0x1ad   :  { %v831_v17 = vpack.c.bf16 %v802_v16, %v801_v15  ;;  %v1299_v19 = vpop.f32.mrf.mxu1 }
 0x1ae   :  { %v650_v21 = vadd.f32 %v1299_v19, %v1600_v25  ;;  %v773_v23 = vmul.f32 0.2, %v639_v47  ;;  %vm741_vm14 = vcmp.ge.f32.partialorder %v639_v47, 0.0  ;;  %v807_v36 = vsel %vm743_vm15, %v647_v18, %v775_v27 }
 0x1af   :  { %v641_v22 = vpop.f32.mrf.mxu1  ;;  %1328 = vmatprep.mubr.msk.bf16.mxu0 %vm162_vm0, %v831_v17 }
 0x1b0   :  { %vm744_vm13 = vcmp.ge.f32.partialorder %v650_v21, 0.0  ;;  %v776_v24 = vmul.f32 0.2, %v650_v21  ;;  %v642_v26 = vadd.f32 %v1600_v25, %v641_v22  ;;  %1329 = vmatmul.mubr.msk.bf16.gmra.mxu0 %vm162_vm0, %v832_v20  ;;  %v805_v33 = vsel %vm741_vm14, %v639_v47, %v773_v23 }
 0x1b1   :  { %v1302_v29 = vpop.f32.mrf.mxu1 }
 0x1b2   :  { %vm742_vm1 = vcmp.ge.f32.partialorder %v642_v26, 0.0  ;;  %v774_v30 = vmul.f32 0.2, %v642_v26  ;;  %v808_v31 = vsel %vm744_vm13, %v650_v21, %v776_v24  ;;  %v663_v39 = vadd.f32 %v1302_v29, %v1600_v25 }
 0x1b3   :  { %v654_v9 = vpop.f32.mrf.mxu1  ;;  %v834_v40 = vpack.c.bf16 %v808_v31, %v807_v36 }
 0x1b4   :  { %v806_v34 = vsel %vm742_vm1, %v642_v26, %v774_v30  ;;  %v655_v35 = vadd.f32 %v1600_v25, %v654_v9  ;;  %v779_v46 = vmul.f32 0.2, %v663_v39  ;;  %vm747_vm4 = vcmp.ge.f32.partialorder %v663_v39, 0.0 }
 0x1b5   :  { %v833_v38 = vpack.c.bf16 %v806_v34, %v805_v33  ;;  %v1303_v32 = vpop.f32.mrf.mxu1 }
 0x1b6   :  { %v666_v41 = vadd.f32 %v1303_v32, %v1600_v25  ;;  %v777_v43 = vmul.f32 0.2, %v655_v35  ;;  %vm745_vm3 = vcmp.ge.f32.partialorder %v655_v35, 0.0  ;;  %v811_v56 = vsel %vm747_vm4, %v663_v39, %v779_v46 }
 0x1b7   :  { %v657_v42 = vpop.f32.mrf.mxu1  ;;  %1332 = vmatprep.mubr.msk.bf16.mxu0 %vm162_vm0, %v833_v38 }
 0x1b8   :  { %vm748_vm2 = vcmp.ge.f32.partialorder %v666_v41, 0.0  ;;  %v780_v44 = vmul.f32 0.2, %v666_v41  ;;  %v658_v45 = vadd.f32 %v1600_v25, %v657_v42  ;;  %1333 = vmatmul.mubr.msk.bf16.gmra.mxu0 %vm162_vm0, %v834_v40  ;;  %v809_v52 = vsel %vm745_vm3, %v655_v35, %v777_v43 }
 0x1b9   :  { %v1306_v48 = vpop.f32.mrf.mxu1 }
 0x1ba   :  { %vm746_vm6 = vcmp.ge.f32.partialorder %v658_v45, 0.0  ;;  %v778_v49 = vmul.f32 0.2, %v658_v45  ;;  %v812_v50 = vsel %vm748_vm2, %v666_v41, %v780_v44  ;;  %v679_v28 = vadd.f32 %v1306_v48, %v1600_v25 }
 0x1bb   :  { %v670_v51 = vpop.f32.mrf.mxu1  ;;  %v836_v60 = vpack.c.bf16 %v812_v50, %v811_v56 }
 0x1bc   :  { %v810_v53 = vsel %vm746_vm6, %v658_v45, %v778_v49  ;;  %v671_v55 = vadd.f32 %v1600_v25, %v670_v51  ;;  %v783_v54 = vmul.f32 0.2, %v679_v28  ;;  %vm751_vm8 = vcmp.ge.f32.partialorder %v679_v28, 0.0 }
 0x1bd   :  { %v835_v57 = vpack.c.bf16 %v810_v53, %v809_v52  ;;  %v1307_v58 = vpop.f32.mrf.mxu1 }
 0x1be   :  { %v682_v61 = vadd.f32 %v1307_v58, %v1600_v25  ;;  %v781_v0 = vmul.f32 0.2, %v671_v55  ;;  %vm749_vm7 = vcmp.ge.f32.partialorder %v671_v55, 0.0  ;;  %v815_v8 = vsel %vm751_vm8, %v679_v28, %v783_v54 }
 0x1bf   :  { %v673_v62 = vpop.f32.mrf.mxu1  ;;  %1336 = vmatprep.mubr.msk.bf16.mxu0 %vm162_vm0, %v835_v57 }
 0x1c0   :  { %vm752_vm5 = vcmp.ge.f32.partialorder %v682_v61, 0.0  ;;  %v784_v37 = vmul.f32 0.2, %v682_v61  ;;  %v674_v1 = vadd.f32 %v1600_v25, %v673_v62  ;;  %1337 = vmatmul.mubr.msk.bf16.gmra.mxu0 %vm162_vm0, %v836_v60  ;;  %v813_v5 = vsel %vm749_vm7, %v671_v55, %v781_v0 }
 0x1c1   :  { %v1310_v63 = vpop.f32.mrf.mxu1 }
 0x1c2   :  { %vm750_vm9 = vcmp.ge.f32.partialorder %v674_v1, 0.0  ;;  %v782_v2 = vmul.f32 0.2, %v674_v1  ;;  %v816_v3 = vsel %vm752_vm5, %v682_v61, %v784_v37  ;;  %v695_v11 = vadd.f32 %v1310_v63, %v1600_v25 }
 0x1c3   :  { %v686_v4 = vpop.f32.mrf.mxu1  ;;  %v838_v13 = vpack.c.bf16 %v816_v3, %v815_v8 }
 0x1c4   :  { %v814_v6 = vsel %vm750_vm9, %v674_v1, %v782_v2  ;;  %v687_v7 = vadd.f32 %v1600_v25, %v686_v4  ;;  %v787_v17 = vmul.f32 0.2, %v695_v11  ;;  %vm755_vm12 = vcmp.ge.f32.partialorder %v695_v11, 0.0 }
 0x1c5   :  { %v837_v10 = vpack.c.bf16 %v814_v6, %v813_v5  ;;  %v1311_v12 = vpop.f32.mrf.mxu1 }
 0x1c6   :  { %v698_v14 = vadd.f32 %v1311_v12, %v1600_v25  ;;  %v785_v16 = vmul.f32 0.2, %v687_v7  ;;  %vm753_vm11 = vcmp.ge.f32.partialorder %v687_v7, 0.0  ;;  %v819_v26 = vsel %vm755_vm12, %v695_v11, %v787_v17 }
 0x1c7   :  { %v689_v15 = vpop.f32.mrf.mxu1  ;;  %1340 = vmatprep.mubr.msk.bf16.mxu0 %vm162_vm0, %v837_v10 }
 0x1c8   :  { %vm756_vm10 = vcmp.ge.f32.partialorder %v698_v14, 0.0  ;;  %v788_v47 = vmul.f32 0.2, %v698_v14  ;;  %v690_v59 = vadd.f32 %v1600_v25, %v689_v15  ;;  %1341 = vmatmul.mubr.msk.bf16.gmra.mxu0 %vm162_vm0, %v838_v13  ;;  %v817_v22 = vsel %vm753_vm11, %v687_v7, %v785_v16 }
 0x1c9   :  { %v1314_v18 = vpop.f32.mrf.mxu1 }
 0x1ca   :  { %vm754_vm13 = vcmp.ge.f32.partialorder %v690_v59, 0.0  ;;  %v786_v19 = vmul.f32 0.2, %v690_v59  ;;  %v820_v20 = vsel %vm756_vm10, %v698_v14, %v788_v47  ;;  %v711_v29 = vadd.f32 %v1314_v18, %v1600_v25 }
 0x1cb   :  { %v702_v21 = vpop.f32.mrf.mxu1  ;;  %v840_v31 = vpack.c.bf16 %v820_v20, %v819_v26 }
 0x1cc   :  { %v818_v23 = vsel %vm754_vm13, %v690_v59, %v786_v19  ;;  %v703_v24 = vadd.f32 %v1600_v25, %v702_v21  ;;  %v791_v38 = vmul.f32 0.2, %v711_v29  ;;  %vm759_vm1 = vcmp.ge.f32.partialorder %v711_v29, 0.0 }
 0x1cd   :  { %v839_v27 = vpack.c.bf16 %v818_v23, %v817_v22  ;;  %v1315_v30 = vpop.f32.mrf.mxu1 }
 0x1ce   :  { %v714_v9 = vadd.f32 %v1315_v30, %v1600_v25  ;;  %v789_v34 = vmul.f32 0.2, %v703_v24  ;;  %vm757_vm15 = vcmp.ge.f32.partialorder %v703_v24, 0.0  ;;  %v823_v45 = vsel %vm759_vm1, %v711_v29, %v791_v38 }
 0x1cf   :  { %v705_v33 = vpop.f32.mrf.mxu1  ;;  %1344 = vmatprep.mubr.msk.bf16.mxu0 %vm162_vm0, %v839_v27 }
 0x1d0   :  { %vm760_vm14 = vcmp.ge.f32.partialorder %v714_v9, 0.0  ;;  %v792_v35 = vmul.f32 0.2, %v714_v9  ;;  %v706_v36 = vadd.f32 %v1600_v25, %v705_v33  ;;  %1345 = vmatmul.mubr.msk.bf16.gmra.mxu0 %vm162_vm0, %v840_v31  ;;  %v821_v42 = vsel %vm757_vm15, %v703_v24, %v789_v34 }
 0x1d1   :  { %v1318_v39 = vpop.f32.mrf.mxu1 }
 0x1d2   :  { %vm758_vm2 = vcmp.ge.f32.partialorder %v706_v36, 0.0  ;;  %v790_v32 = vmul.f32 0.2, %v706_v36  ;;  %v824_v40 = vsel %vm760_vm14, %v714_v9, %v792_v35  ;;  %v727_v48 = vadd.f32 %v1318_v39, %v1600_v25 }
 0x1d3   :  { %v718_v41 = vpop.f32.mrf.mxu1  ;;  %v842_v50 = vpack.c.bf16 %v824_v40, %v823_v45 }
 0x1d4   :  { %v822_v43 = vsel %vm758_vm2, %v706_v36, %v790_v32  ;;  %v719_v44 = vadd.f32 %v1600_v25, %v718_v41  ;;  %v795_v57 = vmul.f32 0.2, %v727_v48  ;;  %vm763_vm6 = vcmp.ge.f32.partialorder %v727_v48, 0.0 }
 0x1d5   :  { %v841_v46 = vpack.c.bf16 %v822_v43, %v821_v42  ;;  %v1319_v49 = vpop.f32.mrf.mxu1 }
 0x1d6   :  { %v730_v51 = vadd.f32 %v1319_v49, %v1600_v25  ;;  %v793_v53 = vmul.f32 0.2, %v719_v44  ;;  %vm761_vm4 = vcmp.ge.f32.partialorder %v719_v44, 0.0  ;;  %v827_v62 = vsel %vm763_vm6, %v727_v48, %v795_v57 }
 0x1d7   :  { %v721_v52 = vpop.f32.mrf.mxu1  ;;  %1348 = vmatprep.mubr.msk.bf16.mxu0 %vm162_vm0, %v841_v46 }
 0x1d8   :  { %vm764_vm3 = vcmp.ge.f32.partialorder %v730_v51, 0.0  ;;  %v796_v55 = vmul.f32 0.2, %v730_v51  ;;  %v722_v56 = vadd.f32 %v1600_v25, %v721_v52  ;;  %1349 = vmatmul.mubr.msk.bf16.gmra.mxu0 %vm162_vm0, %v842_v50  ;;  %v825_v60 = vsel %vm761_vm4, %v719_v44, %v793_v53  ;;  %v1653_v25 = vld [vmem:[%s1821_s6] ss:$0 sm:$0xff] }
 0x1da   :  { %vm762_vm5 = vcmp.ge.f32.partialorder %v722_v56, 0.0  ;;  %v794_v28 = vmul.f32 0.2, %v722_v56  ;;  %v828_v58 = vsel %vm764_vm3, %v730_v51, %v796_v55 }
 0x1db   :  { %v844_v37 = vpack.c.bf16 %v828_v58, %v827_v62 }
 0x1dc   :  { %v826_v61 = vsel %vm762_vm5, %v722_v56, %v794_v28 }
 0x1dd   :  { %v843_v0 = vpack.c.bf16 %v826_v61, %v825_v60 }
 0x1df   :  { %1352 = vmatprep.mubr.msk.bf16.mxu0 %vm162_vm0, %v843_v0 }
 0x1e0   :  { %1353 = vmatmul.mubr.msk.bf16.gmra.mxu0 %vm162_vm0, %v844_v37 }
 0x268   :  { %v1326_v1 = vpop.f32.mrf.mxu0 }
 0x269   :  { %v959_v54 = vadd.f32 %v1326_v1, %v1653_v25 }
 0x26a   :  { %v950_v63 = vpop.f32.mrf.mxu0 }
 0x26b   :  { %1079 = vst.msk [vmem:[%s1822_s7 + $0x10] sm:$0xff] %vm162_vm0, %v959_v54  ;;  %v951_v2 = vadd.f32 %v1653_v25, %v950_v63 }
 0x26c   :  { %v1327_v3 = vpop.f32.mrf.mxu0 }
 0x26d   :  { %1077 = vst.msk [vmem:[%s1822_s7] sm:$0xff] %vm162_vm0, %v951_v2  ;;  %v962_v4 = vadd.f32 %v1327_v3, %v1653_v25 }
 0x26e   :  { %v953_v5 = vpop.f32.mrf.mxu0 }
 0x26f   :  { %1080 = vst.msk [vmem:[%s1822_s7 + $0x18] sm:$0xff] %vm162_vm0, %v962_v4  ;;  %v954_v6 = vadd.f32 %v1653_v25, %v953_v5 }
 0x270   :  { %v1330_v7 = vpop.f32.mrf.mxu0 }
 0x271   :  { %1078 = vst.msk [vmem:[%s1822_s7 + $0x8] sm:$0xff] %vm162_vm0, %v954_v6  ;;  %v975_v8 = vadd.f32 %v1330_v7, %v1653_v25 }
 0x272   :  { %v966_v10 = vpop.f32.mrf.mxu0 }
 0x273   :  { %1083 = vst.msk [vmem:[%s1822_s7 + $0x30] sm:$0xff] %vm162_vm0, %v975_v8  ;;  %v967_v11 = vadd.f32 %v1653_v25, %v966_v10 }
 0x274   :  { %v1331_v12 = vpop.f32.mrf.mxu0 }
 0x275   :  { %1081 = vst.msk [vmem:[%s1822_s7 + $0x20] sm:$0xff] %vm162_vm0, %v967_v11  ;;  %v978_v13 = vadd.f32 %v1331_v12, %v1653_v25 }
 0x276   :  { %v969_v14 = vpop.f32.mrf.mxu0 }
 0x277   :  { %1084 = vst.msk [vmem:[%s1822_s7 + $0x38] sm:$0xff] %vm162_vm0, %v978_v13  ;;  %v970_v15 = vadd.f32 %v1653_v25, %v969_v14 }
 0x278   :  { %v1334_v16 = vpop.f32.mrf.mxu0 }
 0x279   :  { %1082 = vst.msk [vmem:[%s1822_s7 + $0x28] sm:$0xff] %vm162_vm0, %v970_v15  ;;  %v991_v47 = vadd.f32 %v1334_v16, %v1653_v25 }
 0x27a   :  { %v982_v59 = vpop.f32.mrf.mxu0 }
 0x27b   :  { %1087 = vst.msk [vmem:[%s1822_s7 + $0x50] sm:$0xff] %vm162_vm0, %v991_v47  ;;  %v983_v17 = vadd.f32 %v1653_v25, %v982_v59 }
 0x27c   :  { %v1335_v18 = vpop.f32.mrf.mxu0 }
 0x27d   :  { %1085 = vst.msk [vmem:[%s1822_s7 + $0x40] sm:$0xff] %vm162_vm0, %v983_v17  ;;  %v994_v19 = vadd.f32 %v1335_v18, %v1653_v25 }
 0x27e   :  { %v985_v20 = vpop.f32.mrf.mxu0 }
 0x27f   :  { %1088 = vst.msk [vmem:[%s1822_s7 + $0x58] sm:$0xff] %vm162_vm0, %v994_v19  ;;  %v986_v21 = vadd.f32 %v1653_v25, %v985_v20 }
 0x280   :  { %v1338_v22 = vpop.f32.mrf.mxu0 }
 0x281   :  { %1086 = vst.msk [vmem:[%s1822_s7 + $0x48] sm:$0xff] %vm162_vm0, %v986_v21  ;;  %v1007_v23 = vadd.f32 %v1338_v22, %v1653_v25 }
 0x282   :  { %v998_v24 = vpop.f32.mrf.mxu0 }
 0x283   :  { %1091 = vst.msk [vmem:[%s1822_s7 + $0x70] sm:$0xff] %vm162_vm0, %v1007_v23  ;;  %v999_v26 = vadd.f32 %v1653_v25, %v998_v24 }
 0x284   :  { %v1339_v27 = vpop.f32.mrf.mxu0 }
 0x285   :  { %1089 = vst.msk [vmem:[%s1822_s7 + $0x60] sm:$0xff] %vm162_vm0, %v999_v26  ;;  %v1010_v29 = vadd.f32 %v1339_v27, %v1653_v25 }
 0x286   :  { %v1001_v30 = vpop.f32.mrf.mxu0 }
 0x287   :  { %1092 = vst.msk [vmem:[%s1822_s7 + $0x78] sm:$0xff] %vm162_vm0, %v1010_v29  ;;  %v1002_v31 = vadd.f32 %v1653_v25, %v1001_v30 }
 0x288   :  { %v1342_v9 = vpop.f32.mrf.mxu0 }
 0x289   :  { %1090 = vst.msk [vmem:[%s1822_s7 + $0x68] sm:$0xff] %vm162_vm0, %v1002_v31  ;;  %v1023_v33 = vadd.f32 %v1342_v9, %v1653_v25 }
 0x28a   :  { %v1014_v34 = vpop.f32.mrf.mxu0 }
 0x28b   :  { %1095 = vst.msk [vmem:[%s1822_s7 + $0x90] sm:$0xff] %vm162_vm0, %v1023_v33  ;;  %v1015_v35 = vadd.f32 %v1653_v25, %v1014_v34 }
 0x28c   :  { %v1343_v36 = vpop.f32.mrf.mxu0 }
 0x28d   :  { %1093 = vst.msk [vmem:[%s1822_s7 + $0x80] sm:$0xff] %vm162_vm0, %v1015_v35  ;;  %v1026_v38 = vadd.f32 %v1343_v36, %v1653_v25 }
 0x28e   :  { %v1017_v39 = vpop.f32.mrf.mxu0 }
 0x28f   :  { %1096 = vst.msk [vmem:[%s1822_s7 + $0x98] sm:$0xff] %vm162_vm0, %v1026_v38  ;;  %v1018_v32 = vadd.f32 %v1653_v25, %v1017_v39 }
 0x290   :  { %v1346_v40 = vpop.f32.mrf.mxu0 }
 0x291   :  { %1094 = vst.msk [vmem:[%s1822_s7 + $0x88] sm:$0xff] %vm162_vm0, %v1018_v32  ;;  %v1039_v41 = vadd.f32 %v1346_v40, %v1653_v25 }
 0x292   :  { %v1030_v42 = vpop.f32.mrf.mxu0 }
 0x293   :  { %1099 = vst.msk [vmem:[%s1822_s7 + $0xb0] sm:$0xff] %vm162_vm0, %v1039_v41  ;;  %v1031_v43 = vadd.f32 %v1653_v25, %v1030_v42 }
 0x294   :  { %v1347_v44 = vpop.f32.mrf.mxu0 }
 0x295   :  { %1097 = vst.msk [vmem:[%s1822_s7 + $0xa0] sm:$0xff] %vm162_vm0, %v1031_v43  ;;  %v1042_v45 = vadd.f32 %v1347_v44, %v1653_v25 }
 0x296   :  { %v1033_v46 = vpop.f32.mrf.mxu0 }
 0x297   :  { %1100 = vst.msk [vmem:[%s1822_s7 + $0xb8] sm:$0xff] %vm162_vm0, %v1042_v45  ;;  %v1034_v48 = vadd.f32 %v1653_v25, %v1033_v46 }
 0x298   :  { %v1350_v49 = vpop.f32.mrf.mxu0 }
 0x299   :  { %1098 = vst.msk [vmem:[%s1822_s7 + $0xa8] sm:$0xff] %vm162_vm0, %v1034_v48  ;;  %v1055_v50 = vadd.f32 %v1350_v49, %v1653_v25 }
 0x29a   :  { %v1046_v51 = vpop.f32.mrf.mxu0 }
 0x29b   :  { %1103 = vst.msk [vmem:[%s1822_s7 + $0xd0] sm:$0xff] %vm162_vm0, %v1055_v50  ;;  %v1047_v52 = vadd.f32 %v1653_v25, %v1046_v51 }
 0x29c   :  { %v1351_v53 = vpop.f32.mrf.mxu0 }
 0x29d   :  { %1101 = vst.msk [vmem:[%s1822_s7 + $0xc0] sm:$0xff] %vm162_vm0, %v1047_v52  ;;  %v1058_v55 = vadd.f32 %v1351_v53, %v1653_v25 }
 0x29e   :  { %v1049_v56 = vpop.f32.mrf.mxu0 }
 0x29f   :  { %1104 = vst.msk [vmem:[%s1822_s7 + $0xd8] sm:$0xff] %vm162_vm0, %v1058_v55  ;;  %v1050_v57 = vadd.f32 %v1653_v25, %v1049_v56 }
 0x2a0   :  { %v1354_v28 = vpop.f32.mrf.mxu0 }
 0x2a1   :  { %1102 = vst.msk [vmem:[%s1822_s7 + $0xc8] sm:$0xff] %vm162_vm0, %v1050_v57  ;;  %v1071_v58 = vadd.f32 %v1354_v28, %v1653_v25 }
 0x2a2   :  { %v1062_v60 = vpop.f32.mrf.mxu0 }
 0x2a3   :  { %1107 = vst.msk [vmem:[%s1822_s7 + $0xf0] sm:$0xff] %vm162_vm0, %v1071_v58  ;;  %v1063_v61 = vadd.f32 %v1653_v25, %v1062_v60 }
 0x2a4   :  { %v1355_v62 = vpop.f32.mrf.mxu0 }
 0x2a5   :  { %1105 = vst.msk [vmem:[%s1822_s7 + $0xe0] sm:$0xff] %vm162_vm0, %v1063_v61  ;;  %v1074_v0 = vadd.f32 %v1355_v62, %v1653_v25 }
 0x2a6   :  { %v1065_v37 = vpop.f32.mrf.mxu0 }
 0x2a7   :  { %1108 = vst.msk [vmem:[%s1822_s7 + $0xf8] sm:$0xff] %vm162_vm0, %v1074_v0  ;;  %v1066_v1 = vadd.f32 %v1653_v25, %v1065_v37 }
 0x2a9   :  { %1106 = vst.msk [vmem:[%s1822_s7 + $0xe8] sm:$0xff] %vm162_vm0, %v1066_v1 }

</bundles_post_ra>
